<compile_context>
chip_gen: v7x
topology: tpu7x:2x2x1
jax: 0.10.0
libtpu: 0.0.40
codegen_flags: <defaults>
</compile_context>

<pallas_src>
import jax
import jax.numpy as jnp
from jax.experimental import pallas as pl
from jax.experimental.pallas import tpu as pltpu


LANE_PAD = 128  # lane-dense output width; real output column is lane 0


def mlp_kernel(x_ref, w1_ref, b1_ref, w2_ref, b2_ref, w3_ref, b3_ref, o_ref):
    # Cast x f32 -> bf16 on the VPU (free filler slot) right before the MXU.
    x_bf = x_ref[...].astype(jnp.bfloat16)

    # fc1 + ReLU: bf16 MXU matmul, f32 accumulate.
    h1 = jnp.dot(x_bf, w1_ref[...], preferred_element_type=jnp.float32)
    h1 = jnp.maximum(h1 + b1_ref[...], 0.0)

    # fc2 + ReLU: cast the f32 activation back to bf16 for the MXU.
    h2 = jnp.dot(h1.astype(w2_ref.dtype), w2_ref[...],
                 preferred_element_type=jnp.float32)
    h2 = jnp.maximum(h2 + b2_ref[...], 0.0)

    # fc3 (out_features = 1): VPU multiply + lane (XLU) reduction instead of
    # an N=1 MXU matmul; b3 is a scalar read from SMEM.
    out = jnp.sum(h2 * w3_ref[...], axis=-1, keepdims=True) + b3_ref[0]

    # Lane-dense, unmasked store: replicate the single output column across
    # all 128 lanes; the wrapper slices lane 0.
    o_ref[...] = jnp.broadcast_to(out, o_ref.shape).astype(o_ref.dtype)


def _pick_tb(batch):
    """Batch tile: multiples of 16 (bf16 sublane pack); >= 2 grid steps once
    the batch is big enough so a v7x chip's two TensorCores both get work on
    the 'parallel' grid axis. Small batches run as a single grid step."""
    if batch < 32:
        return batch
    tb = min(256, batch // 2)
    tb = max(16, (tb // 16) * 16)
    return tb


def _default_vmem_limit():
    """Per-generation scoped VMEM limit: generous on v5e/v6e (128 MiB
    physical), conservative on v7x (64 MiB physical)."""
    try:
        cap = pltpu.get_tpu_info().vmem_capacity_bytes
    except Exception:
        cap = 0
    if cap >= 128 * 1024 * 1024:      # v5e / v6e
        return 64 * 1024 * 1024
    return 48 * 1024 * 1024           # v7x (or unknown): stay under 64 MiB


def prepare_params(w1, b1, w2, b2, w3, b3):
    """Cast parameters to their kernel dtypes ONCE (call at model-load time,
    not inside the per-call forward). Weights -> bf16, biases / fc3 row -> f32."""
    H = w1.shape[1]
    return {
        "w1": jnp.asarray(w1, jnp.bfloat16),              # (V, H)
        "b1": jnp.asarray(b1, jnp.float32).reshape(1, H),  # (1, H)
        "w2": jnp.asarray(w2, jnp.bfloat16),              # (H, H)
        "b2": jnp.asarray(b2, jnp.float32).reshape(1, H),  # (1, H)
        "w3": jnp.asarray(w3, jnp.float32).reshape(1, H),  # fc3 as lane reduction
        "b3": jnp.asarray(b3, jnp.float32).reshape(1),     # scalar -> SMEM
    }


def feedforward_nn(x, params, *, tb=None, vmem_limit_bytes=None):
    """Fused forward pass of FeedForwardNN.

    x:      (B, V) float32 (cast to bf16 inside the kernel)
    params: dict from prepare_params()
    returns (B, 1) float32
    """
    B, V = x.shape
    H = params["w1"].shape[1]

    if tb is None:
        tb = _pick_tb(B)
    if vmem_limit_bytes is None:
        vmem_limit_bytes = _default_vmem_limit()

    # Pad the batch up to a multiple of tb (pad rows are free MXU filler and
    # are sliced off below) so the parallel grid axis stays shardable.
    pad = (-B) % tb
    if pad:
        x = jnp.pad(x, ((0, pad), (0, 0)))
    Bp = B + pad
    grid = (Bp // tb,)

    # Constant-index weight specs: single-buffer (their block never changes).
    def _resident(shape):
        return pl.BlockSpec(shape, lambda i: (0, 0), pipeline_mode=pl.Buffered(1))

    out_padded = pl.pallas_call(
        mlp_kernel,
        out_shape=jax.ShapeDtypeStruct((Bp, LANE_PAD), jnp.float32),
        grid_spec=pltpu.PrefetchScalarGridSpec(
            num_scalar_prefetch=0,
            grid=grid,
            in_specs=[
                pl.BlockSpec((tb, V), lambda i: (i, 0)),   # x tile (f32, cast in kernel)
                _resident((V, H)),                         # W1 resident (bf16)
                _resident((1, H)),                         # b1 (f32)
                _resident((H, H)),                         # W2 resident (bf16)
                _resident((1, H)),                         # b2 (f32)
                _resident((1, H)),                         # w3 row (f32)
                pl.BlockSpec(memory_space=pltpu.MemorySpace.SMEM),  # b3 scalar
            ],
            out_specs=pl.BlockSpec((tb, LANE_PAD), lambda i: (i, 0)),
        ),
        compiler_params=pltpu.CompilerParams(
            dimension_semantics=("parallel",),
            vmem_limit_bytes=vmem_limit_bytes,
        ),
    )(x, params["w1"], params["b1"], params["w2"], params["b2"],
      params["w3"], params["b3"])

    return out_padded[:B, :1]


def _init_linear(key, fan_in, fan_out):
    """Deterministic init mimicking nn.Linear's U(-1/sqrt(fan_in), 1/sqrt(fan_in)).
    Returns W with shape (fan_in, fan_out) (transposed vs PyTorch) and b (1, fan_out)."""
    kw, kb = jax.random.split(key)
    bound = 1.0 / (fan_in ** 0.5)
    w = jax.random.uniform(kw, (fan_in, fan_out), jnp.float32, -bound, bound)
    b = jax.random.uniform(kb, (1, fan_out), jnp.float32, -bound, bound)
    return w, b


if __name__ == "__main__":
    # Small, MXU/vreg-friendly shapes consistent with the module:
    # vocab_size=512 (bag-of-words input dim), hidden_size=256, batch=16.
    batch, vocab_size, hidden_size = 16, 512, 256

    key = jax.random.PRNGKey(0)
    kx, k1, k2, k3 = jax.random.split(key, 4)

    x = jax.random.normal(kx, (batch, vocab_size), jnp.float32)
    w1, b1 = _init_linear(k1, vocab_size, hidden_size)
    w2, b2 = _init_linear(k2, hidden_size, hidden_size)
    w3, b3 = _init_linear(k3, hidden_size, 1)

    # Cast parameters to kernel dtypes ONCE (load-time), then run forward.
    params = prepare_params(w1, b1, w2, b2, w3, b3)
    out = feedforward_nn(x, params)
    out = jax.block_until_ready(out)
    assert out.shape == (batch, 1)

    # Tight check vs a reference using the same bf16 input/weight rounding and
    # f32 accumulation as the kernel.
    xb, w1b, w2b = (a.astype(jnp.bfloat16) for a in (x, w1, w2))
    h1 = jnp.maximum(jnp.dot(xb, w1b, preferred_element_type=jnp.float32) + b1, 0.0)
    h2 = jnp.maximum(
        jnp.dot(h1.astype(jnp.bfloat16), w2b, preferred_element_type=jnp.float32) + b2,
        0.0)
    ref_bf16 = jnp.sum(h2 * w3.reshape(1, -1), axis=-1, keepdims=True) + b3
    assert jnp.allclose(out, ref_bf16, atol=2e-3, rtol=2e-3)

    # Loose check vs the full-f32 PyTorch-semantics reference; bf16
    # weights/activations are the intentional precision trade-off.
    ref_f32 = jnp.maximum(x @ w1 + b1, 0.0)
    ref_f32 = jnp.maximum(ref_f32 @ w2 + b2, 0.0)
    ref_f32 = ref_f32 @ w3 + b3
    assert jnp.allclose(out, ref_f32, atol=5e-2, rtol=5e-2)

    # Exercise the batch-padding / multi-step parallel-grid path as well
    # (B=40 -> tb=16, 3 grid steps after padding to 48 rows).
    x_big = jax.random.normal(kx, (40, vocab_size), jnp.float32)
    out_big = jax.block_until_ready(feedforward_nn(x_big, params))
    ref_big = jnp.maximum(x_big @ w1 + b1, 0.0)
    ref_big = jnp.maximum(ref_big @ w2 + b2, 0.0)
    ref_big = ref_big @ w3 + b3
    assert out_big.shape == (40, 1)
    assert jnp.allclose(out_big, ref_big, atol=5e-2, rtol=5e-2)

    print("KERNEL_OK")
</pallas_src>

<mosaic_0001>
module attributes {stable_mosaic.version = 11 : i64} {
  func.func @mlp_kernel(%arg0: i32, %arg1: memref<16x512xf32, #tpu.memory_space<vmem>>, %arg2: memref<512x256xbf16, #tpu.memory_space<vmem>>, %arg3: memref<1x256xf32, #tpu.memory_space<vmem>>, %arg4: memref<256x256xbf16, #tpu.memory_space<vmem>>, %arg5: memref<1x256xf32, #tpu.memory_space<vmem>>, %arg6: memref<1x256xf32, #tpu.memory_space<vmem>>, %arg7: memref<1xf32, #tpu.memory_space<smem>>, %arg8: memref<16x128xf32, #tpu.memory_space<vmem>>) attributes {dimension_semantics = [#tpu.dimension_semantics<parallel>], iteration_bounds = array<i64: 1>, scalar_prefetch = 0 : i64, scratch_operands = 0 : i64, tpu.core_type = #tpu.core_type<tc>, window_params = [{transform_indices = @transform_0, window_bounds = array<i64: 16, 512>}, {pipeline_mode = #tpu.pipeline_mode<synchronous>, transform_indices = @transform_1, window_bounds = array<i64: 512, 256>}, {pipeline_mode = #tpu.pipeline_mode<synchronous>, transform_indices = @transform_2, window_bounds = array<i64: 1, 256>}, {pipeline_mode = #tpu.pipeline_mode<synchronous>, transform_indices = @transform_3, window_bounds = array<i64: 256, 256>}, {pipeline_mode = #tpu.pipeline_mode<synchronous>, transform_indices = @transform_4, window_bounds = array<i64: 1, 256>}, {pipeline_mode = #tpu.pipeline_mode<synchronous>, transform_indices = @transform_5, window_bounds = array<i64: 1, 256>}, {transform_indices = @transform_6, window_bounds = array<i64: 1>}, {transform_indices = @transform_7, window_bounds = array<i64: 16, 128>}]} {
    %c0 = arith.constant 0 : index
    %c0_0 = arith.constant 0 : index
    %0 = vector.load %arg1[%c0, %c0_0] : memref<16x512xf32, #tpu.memory_space<vmem>>, vector<16x512xf32>
    %1 = arith.truncf %0 : vector<16x512xf32> to vector<16x512xbf16>
    %c0_1 = arith.constant 0 : index
    %c0_2 = arith.constant 0 : index
    %2 = vector.load %arg2[%c0_1, %c0_2] : memref<512x256xbf16, #tpu.memory_space<vmem>>, vector<512x256xbf16>
    %cst = arith.constant dense<0.000000e+00> : vector<16x256xf32>
    %3 = tpu.matmul %1, %2, %cst {dimension_numbers = #tpu.dot_dimension_numbers<[1], [0], [0], [1], [0, 0, 1, 1], [], []>} : vector<16x512xbf16>, vector<512x256xbf16>, vector<16x256xf32> -> vector<16x256xf32>
    %c0_3 = arith.constant 0 : index
    %c0_4 = arith.constant 0 : index
    %4 = vector.load %arg3[%c0_3, %c0_4] : memref<1x256xf32, #tpu.memory_space<vmem>>, vector<1x256xf32>
    %5 = vector.broadcast %4 : vector<1x256xf32> to vector<16x256xf32>
    %6 = arith.addf %3, %5 : vector<16x256xf32>
    %cst_5 = arith.constant 0.000000e+00 : f32
    %7 = vector.broadcast %cst_5 : f32 to vector<16x256xf32>
    %8 = arith.maximumf %6, %7 : vector<16x256xf32>
    %9 = arith.truncf %8 : vector<16x256xf32> to vector<16x256xbf16>
    %c0_6 = arith.constant 0 : index
    %c0_7 = arith.constant 0 : index
    %10 = vector.load %arg4[%c0_6, %c0_7] : memref<256x256xbf16, #tpu.memory_space<vmem>>, vector<256x256xbf16>
    %cst_8 = arith.constant dense<0.000000e+00> : vector<16x256xf32>
    %11 = tpu.matmul %9, %10, %cst_8 {dimension_numbers = #tpu.dot_dimension_numbers<[1], [0], [0], [1], [0, 0, 1, 1], [], []>} : vector<16x256xbf16>, vector<256x256xbf16>, vector<16x256xf32> -> vector<16x256xf32>
    %c0_9 = arith.constant 0 : index
    %c0_10 = arith.constant 0 : index
    %12 = vector.load %arg5[%c0_9, %c0_10] : memref<1x256xf32, #tpu.memory_space<vmem>>, vector<1x256xf32>
    %13 = vector.broadcast %12 : vector<1x256xf32> to vector<16x256xf32>
    %14 = arith.addf %11, %13 : vector<16x256xf32>
    %cst_11 = arith.constant 0.000000e+00 : f32
    %15 = vector.broadcast %cst_11 : f32 to vector<16x256xf32>
    %16 = arith.maximumf %14, %15 : vector<16x256xf32>
    %c0_12 = arith.constant 0 : index
    %c0_13 = arith.constant 0 : index
    %17 = vector.load %arg6[%c0_12, %c0_13] : memref<1x256xf32, #tpu.memory_space<vmem>>, vector<1x256xf32>
    %18 = vector.broadcast %17 : vector<1x256xf32> to vector<16x256xf32>
    %19 = arith.mulf %16, %18 : vector<16x256xf32>
    %cst_14 = arith.constant dense<0.000000e+00> : vector<16xf32>
    %20 = vector.multi_reduction <add>, %19, %cst_14 [1] : vector<16x256xf32> to vector<16xf32>
    %21 = vector.shape_cast %20 : vector<16xf32> to vector<16x1xf32>
    %c0_15 = arith.constant 0 : index
    %22 = memref.load %arg7[%c0_15] : memref<1xf32, #tpu.memory_space<smem>>
    %23 = vector.broadcast %22 : f32 to vector<16x1xf32>
    %24 = arith.addf %21, %23 : vector<16x1xf32>
    %25 = vector.shape_cast %24 : vector<16x1xf32> to vector<16x1xf32>
    %26 = vector.broadcast %25 : vector<16x1xf32> to vector<16x128xf32>
    %c0_16 = arith.constant 0 : index
    %c0_17 = arith.constant 0 : index
    %27 = vector.load %arg8[%c0_16, %c0_17] : memref<16x128xf32, #tpu.memory_space<vmem>>, vector<16x128xf32>
    tpu.vector_store %arg8[%c0_16, %c0_17], %26 {strides = array<i32>} : memref<16x128xf32, #tpu.memory_space<vmem>>, vector<16x128xf32>,
    return
  }
  func.func @transform_0(%arg0: i32) -> (i32, i32) {
    %c0_i32 = arith.constant 0 : i32
    %c0_i32_0 = arith.constant 0 : i32
    return %arg0, %c0_i32 : i32, i32
  }
  func.func @transform_1(%arg0: i32) -> (i32, i32) {
    %c0_i32 = arith.constant 0 : i32
    %c0_i32_0 = arith.constant 0 : i32
    %c0_i32_1 = arith.constant 0 : i32
    return %c0_i32, %c0_i32_0 : i32, i32
  }
  func.func @transform_2(%arg0: i32) -> (i32, i32) {
    %c0_i32 = arith.constant 0 : i32
    %c0_i32_0 = arith.constant 0 : i32
    %c0_i32_1 = arith.constant 0 : i32
    return %c0_i32, %c0_i32_0 : i32, i32
  }
  func.func @transform_3(%arg0: i32) -> (i32, i32) {
    %c0_i32 = arith.constant 0 : i32
    %c0_i32_0 = arith.constant 0 : i32
    %c0_i32_1 = arith.constant 0 : i32
    return %c0_i32, %c0_i32_0 : i32, i32
  }
  func.func @transform_4(%arg0: i32) -> (i32, i32) {
    %c0_i32 = arith.constant 0 : i32
    %c0_i32_0 = arith.constant 0 : i32
    %c0_i32_1 = arith.constant 0 : i32
    return %c0_i32, %c0_i32_0 : i32, i32
  }
  func.func @transform_5(%arg0: i32) -> (i32, i32) {
    %c0_i32 = arith.constant 0 : i32
    %c0_i32_0 = arith.constant 0 : i32
    %c0_i32_1 = arith.constant 0 : i32
    return %c0_i32, %c0_i32_0 : i32, i32
  }
  func.func @transform_6(%arg0: i32) -> i32 {
    %c0_i32 = arith.constant 0 : i32
    %c0_i32_0 = arith.constant 0 : i32
    return %c0_i32 : i32
  }
  func.func @transform_7(%arg0: i32) -> (i32, i32) {
    %c0_i32 = arith.constant 0 : i32
    %c0_i32_0 = arith.constant 0 : i32
    return %arg0, %c0_i32 : i32, i32
  }
}

</mosaic_0001>

<bundles_post_ra>
// kernel: tpu_custom_call.1
= control target key start
LH: loop header
LB: loop body
LE: loop exit
PB: predicated region body
PF: predicated region fallthrough
CT: control target
= control target key end

     0   :  { %13 = vsyncpa [#allocation4], 0  ;;  %s1333_s0 = inlined_call_operand.hbm [shape: f32[16,512], index: 0, kind: input, shape index: {}]   ;;  %s1334_s1 = inlined_call_operand.hbm [shape: bf16[512,256], index: 1, kind: input, shape index: {}]   ;;  %s1335_s2 = inlined_call_operand.vmem [shape: f32[1,256], index: 2, kind: input, shape index: {}]   ;;  %s1336_s3 = inlined_call_operand.hbm [shape: bf16[256,256], index: 3, kind: input, shape index: {}]   ;;  %s1337_s4 = inlined_call_operand.vmem [shape: f32[1,256], index: 4, kind: input, shape index: {}]   ;;  %s1338_s5 = inlined_call_operand.vmem [shape: f32[1,256], index: 5, kind: input, shape index: {}]   ;;  %s1339_s6 = inlined_call_operand.<no memory space> [shape: f32[1], index: 6, kind: input, shape index: {}]   ;;  %s1340_s7 = inlined_call_operand.hbm [shape: f32[16,128], index: 7, kind: output, shape index: {}]  }
   0x1   :  { %14 = vsyncpa [#allocation7], 0 }
   0x2   :  { %15 = vsyncpa [#allocation5], 0  ;;  %s1216_s24 = smov [#allocation6]   ;;  %s1122_s28 = scalar_lea.hbm %s1334_s1, 8192 }
   0x3   :  { %s33_s25 = sshll.u32 %s1216_s24, 4  ;;  %p1123_p0 = scmp.ne.s32.totalorder %s1334_s1, %s1122_s28  ;;  %s34_s25 = int_to_ptr.vmem [resolvable:$true] %s33_s25 }
   0x4   :  { %p1126_p1 = scmp.lt.u32.totalorder %s1122_s28, %s1334_s1 }
   0x6   :  { %p1128_p2 = pnand %p1126_p1, %p1123_p0 }
   0x8   :  { %1131 = shalt.err (!%p1128_p2)
}
   0x9   :  { %s1132_s10 = scalar_lea.vmem %s34_s25, 8192  ;;  %p1137_p4 = scmp.lt.s32.totalorder %s34_s25, %s34_s25 }
   0xa   :  { %p1133_p3 = scmp.ne.s32.totalorder %s34_s25, %s1132_s10  ;;  %p1138_p5 = scmp.lt.s32.totalorder %s1132_s10, %s1132_s10 }
   0xc   :  { %p1139_p6 = por %p1138_p5, %p1137_p4 }
   0xe   :  { %p1140_p7 = pnand %p1139_p6, %p1133_p3 }
  0x10   :  { %1143 = shalt.err (!%p1140_p7)
}
  0x11   :  { %s1217_s11 = smov 128   ;;  %s1218_s12 = smov 8  }
  0x12   :  { %39 = dma.hbm_to_vmem [thread:$0]  %s1334_s1, 8192, %s34_s25, [#allocation7], %s1217_s11, %s1217_s11, %s1218_s12  }
  0x13   :  { %s1219_s15 = smov [#allocation3]   ;;  %s1144_s19 = scalar_lea.hbm %s1333_s0, 1024 }
  0x14   :  { %s21_s16 = sshll.u32 %s1219_s15, 4  ;;  %p1145_p8 = scmp.ne.s32.totalorder %s1333_s0, %s1144_s19  ;;  %s22_s16 = int_to_ptr.vmem [resolvable:$true] %s21_s16 }
  0x15   :  { %p1148_p9 = scmp.lt.u32.totalorder %s1144_s19, %s1333_s0 }
  0x17   :  { %p1150_p10 = pnand %p1148_p9, %p1145_p8 }
  0x19   :  { %1153 = shalt.err (!%p1150_p10)
}
  0x1a   :  { %s1154_s24 = scalar_lea.vmem %s22_s16, 1024  ;;  %p1159_p12 = scmp.lt.s32.totalorder %s22_s16, %s22_s16 }
  0x1b   :  { %p1155_p11 = scmp.ne.s32.totalorder %s22_s16, %s1154_s24  ;;  %p1160_p13 = scmp.lt.s32.totalorder %s1154_s24, %s1154_s24 }
  0x1d   :  { %p1161_p0 = por %p1160_p13, %p1159_p12 }
  0x1f   :  { %p1162_p1 = pnand %p1161_p0, %p1155_p11 }
  0x21   :  { %1165 = shalt.err (!%p1162_p1)
}
  0x22   :  { %s1220_s1 = smov 512   ;;  %s1221_s25 = smov 32  }
  0x23   :  { %27 = dma.hbm_to_vmem [thread:$0]  %s1333_s0, 1024, %s22_s16, [#allocation4], %s1220_s1, %s1220_s1, %s1221_s25  }
  0x24   :  { %s1222_s28 = smov [#allocation8]   ;;  %s1166_s9 = scalar_lea.hbm %s1336_s3, 4096 }
  0x25   :  { %s47_s29 = sshll.u32 %s1222_s28, 4  ;;  %p1167_p2 = scmp.ne.s32.totalorder %s1336_s3, %s1166_s9  ;;  %s48_s29 = int_to_ptr.vmem [resolvable:$true] %s47_s29 }
  0x26   :  { %p1170_p3 = scmp.lt.u32.totalorder %s1166_s9, %s1336_s3 }
  0x28   :  { %p1172_p4 = pnand %p1170_p3, %p1167_p2 }
  0x2a   :  { %1175 = shalt.err (!%p1172_p4)
}
  0x2b   :  { %s1176_s17 = scalar_lea.vmem %s48_s29, 4096  ;;  %p1181_p6 = scmp.lt.s32.totalorder %s48_s29, %s48_s29 }
  0x2c   :  { %p1177_p5 = scmp.ne.s32.totalorder %s48_s29, %s1176_s17  ;;  %p1182_p7 = scmp.lt.s32.totalorder %s1176_s17, %s1176_s17 }
  0x2e   :  { %p1183_p8 = por %p1182_p7, %p1181_p6 }
  0x30   :  { %p1184_p9 = pnand %p1183_p8, %p1177_p5 }
  0x32   :  { %1187 = shalt.err (!%p1184_p9)
}
  0x33   :  { %53 = dma.hbm_to_vmem [thread:$0]  %s1336_s3, 4096, %s48_s29, [#allocation7], %s1217_s11, %s1217_s11, %s1218_s12  }
  0x34   :  { %1210 = dma.done.wait [#allocation4], 1024  }
  0x35   :  { %1211 = vsyncadd [#allocation4], 4294966272 }
  0x36   :  { %1212 = dma.done.wait [#allocation7], 12288  }
  0x37   :  { %1213 = vsyncadd [#allocation7], 4294955008  ;;  %v978_v0 = vld [vmem:[#allocation6 + $0x4] ss:$8 sps:$4 sm:$0xff]   ;;  %v980_v1 = vld [vmem:[#allocation6] ss:$8 sps:$4 sm:$0xff]  }
  0x38   :  { %477 = vmatprep.subr.bf16.mxu0 %v978_v0  ;;  %v981_v2 = vld [vmem:[#allocation6 + $0x14] ss:$8 sps:$4 sm:$0xff]   ;;  %v983_v3 = vld [vmem:[#allocation6 + $0x10] ss:$8 sps:$4 sm:$0xff]   ;;  %v984_v4 = vld [vmem:[#allocation6 + $0x24] ss:$8 sps:$4 sm:$0xff]  }
  0x39   :  { %478 = vmatpush1.bf16.msra.mxu0 %v980_v1  ;;  %v986_v5 = vld [vmem:[#allocation6 + $0x20] ss:$8 sps:$4 sm:$0xff]   ;;  %v987_v6 = vld [vmem:[#allocation6 + $0x34] ss:$8 sps:$4 sm:$0xff]   ;;  %v989_v7 = vld [vmem:[#allocation6 + $0x30] ss:$8 sps:$4 sm:$0xff]  }
  0x3a   :  { %479 = vmatprep.subr.bf16.mxu0 %v981_v2  ;;  %v990_v8 = vld [vmem:[#allocation6 + $0x44] ss:$8 sps:$4 sm:$0xff]   ;;  %v992_v9 = vld [vmem:[#allocation6 + $0x40] ss:$8 sps:$4 sm:$0xff]   ;;  %v993_v10 = vld [vmem:[#allocation6 + $0x54] ss:$8 sps:$4 sm:$0xff]  }
  0x3b   :  { %v995_v11 = vld [vmem:[#allocation6 + $0x50] ss:$8 sps:$4 sm:$0xff]   ;;  %v996_v12 = vld [vmem:[#allocation6 + $0x64] ss:$8 sps:$4 sm:$0xff]   ;;  %v998_v16 = vld [vmem:[#allocation6 + $0x60] ss:$8 sps:$4 sm:$0xff]  }
  0x3c   :  { %v70_v13 = vld [vmem:[#allocation3 + $0x8] sm:$0xff]  ;;  %v999_v17 = vld [vmem:[#allocation6 + $0x74] ss:$8 sps:$4 sm:$0xff]   ;;  %v1001_v18 = vld [vmem:[#allocation6 + $0x70] ss:$8 sps:$4 sm:$0xff]   ;;  %s1223_s22 = smov [#allocation9]  }
  0x3d   :  { %480 = vmatpush1.bf16.msra.mxu0 %v983_v3  ;;  %v74_v14 = vld [vmem:[#allocation3 + $0x28] sm:$0xff]  ;;  %v1005_v21 = vld [vmem:[#allocation6 + $0x94] ss:$8 sps:$4 sm:$0xff]   ;;  %v1007_v22 = vld [vmem:[#allocation6 + $0x90] ss:$8 sps:$4 sm:$0xff]   ;;  %s853_s23 = sshll.u32 %s1223_s22, 4  ;;  %s854_s23 = int_to_ptr.vmem [resolvable:$true] %s853_s23 }
  0x3e   :  { %481 = vmatprep.subr.bf16.mxu0 %v984_v4  ;;  %v78_v15 = vpack.c.bf16 %v74_v14, %v70_v13  ;;  %v1002_v19 = vld [vmem:[#allocation6 + $0x84] ss:$8 sps:$4 sm:$0xff]   ;;  %v1004_v20 = vld [vmem:[#allocation6 + $0x80] ss:$8 sps:$4 sm:$0xff]   ;;  %v1011_v25 = vld [vmem:[#allocation6 + $0xb4] ss:$8 sps:$4 sm:$0xff]   ;;  %p1193_p11 = scmp.lt.s32.totalorder %s854_s23, %s854_s23 }
  0x3f   :  { %v1008_v23 = vld [vmem:[#allocation6 + $0xa4] ss:$8 sps:$4 sm:$0xff]   ;;  %v1010_v24 = vld [vmem:[#allocation6 + $0xa0] ss:$8 sps:$4 sm:$0xff]   ;;  %v1013_v26 = vld [vmem:[#allocation6 + $0xb0] ss:$8 sps:$4 sm:$0xff]  }
  0x40   :  { %509 = vmatprep.mubr.bf16.mxu0 %v78_v15  ;;  %v1014_v27 = vld [vmem:[#allocation6 + $0xc4] ss:$8 sps:$4 sm:$0xff]   ;;  %v1076_v29 = vld [vmem:[#allocation8] ss:$8 sps:$4 sm:$0xff]   ;;  %v1077_v31 = vld [vmem:[#allocation8 + $0x14] ss:$8 sps:$4 sm:$0xff]  }
  0x41   :  { %482 = vmatpush1.bf16.msra.mxu0 %v986_v5  ;;  %v1074_v28 = vld [vmem:[#allocation8 + $0x4] ss:$8 sps:$4 sm:$0xff]   ;;  %v1016_v30 = vld [vmem:[#allocation6 + $0xc0] ss:$8 sps:$4 sm:$0xff]   ;;  %v1017_v32 = vld [vmem:[#allocation6 + $0xd4] ss:$8 sps:$4 sm:$0xff]  }
  0x42   :  { %483 = vmatprep.subr.bf16.mxu0 %v987_v6  ;;  %773 = vmatprep.subr.bf16.mxu1 %v1074_v28  ;;  %v1079_v33 = vld [vmem:[#allocation8 + $0x10] ss:$8 sps:$4 sm:$0xff]   ;;  %v1080_v34 = vld [vmem:[#allocation8 + $0x24] ss:$8 sps:$4 sm:$0xff]   ;;  %v1082_v37 = vld [vmem:[#allocation8 + $0x20] ss:$8 sps:$4 sm:$0xff]  }
  0x43   :  { %774 = vmatpush1.bf16.msra.mxu1 %v1076_v29  ;;  %v1019_v35 = vld [vmem:[#allocation6 + $0xd0] ss:$8 sps:$4 sm:$0xff]   ;;  %v1020_v36 = vld [vmem:[#allocation6 + $0xe4] ss:$8 sps:$4 sm:$0xff]   ;;  %v1083_v38 = vld [vmem:[#allocation8 + $0x34] ss:$8 sps:$4 sm:$0xff]  }
  0x44   :  { %775 = vmatprep.subr.bf16.mxu1 %v1077_v31  ;;  %v1022_v39 = vld [vmem:[#allocation6 + $0xe0] ss:$8 sps:$4 sm:$0xff]   ;;  %v1023_v40 = vld [vmem:[#allocation6 + $0xf4] ss:$8 sps:$4 sm:$0xff]   ;;  %v1025_v41 = vld [vmem:[#allocation6 + $0xf0] ss:$8 sps:$4 sm:$0xff]  }
  0x45   :  { %484 = vmatpush1.bf16.msra.mxu0 %v989_v7  ;;  %v1085_v42 = vld [vmem:[#allocation8 + $0x30] ss:$8 sps:$4 sm:$0xff]   ;;  %v1028_v43 = vld [vmem:[#allocation6 + $0x104] ss:$8 sps:$4 sm:$0xff]   ;;  %v1088_v49 = vld [vmem:[#allocation8 + $0x40] ss:$8 sps:$4 sm:$0xff]  }
  0x46   :  { %485 = vmatprep.subr.bf16.mxu0 %v990_v8  ;;  %v69_v44 = vld [vmem:[#allocation3] sm:$0xff]  ;;  %v72_v47 = vld [vmem:[#allocation3 + $0x18] sm:$0xff]  ;;  %s1188_s24 = scalar_lea.vmem %s854_s23, 256 }
  0x47   :  { %776 = vmatpush1.bf16.msra.mxu1 %v1079_v33  ;;  %v1086_v45 = vld [vmem:[#allocation8 + $0x44] ss:$8 sps:$4 sm:$0xff]   ;;  %v76_v48 = vld [vmem:[#allocation3 + $0x38] sm:$0xff]  ;;  %v1026_v52 = vld [vmem:[#allocation6 + $0x100] ss:$8 sps:$4 sm:$0xff]   ;;  %p1189_p10 = scmp.ne.s32.totalorder %s854_s23, %s1188_s24  ;;  %p1194_p12 = scmp.lt.s32.totalorder %s1188_s24, %s1188_s24 }
  0x48   :  { %777 = vmatprep.subr.bf16.mxu1 %v1080_v34  ;;  %v73_v46 = vld [vmem:[#allocation3 + $0x20] sm:$0xff]  ;;  %v1089_v51 = vld [vmem:[#allocation8 + $0x54] ss:$8 sps:$4 sm:$0xff]   ;;  %v80_v54 = vpack.c.bf16 %v76_v48, %v72_v47  ;;  %v1091_v55 = vld [vmem:[#allocation8 + $0x50] ss:$8 sps:$4 sm:$0xff]  }
  0x49   :  { %486 = vmatpush1.bf16.msra.mxu0 %v992_v9  ;;  %v77_v50 = vpack.c.bf16 %v73_v46, %v69_v44  ;;  %v1031_v53 = vld [vmem:[#allocation6 + $0x114] ss:$8 sps:$4 sm:$0xff]   ;;  %v1092_v56 = vld [vmem:[#allocation8 + $0x64] ss:$8 sps:$4 sm:$0xff]   ;;  %v1029_v57 = vld [vmem:[#allocation6 + $0x110] ss:$8 sps:$4 sm:$0xff]   ;;  %v147_v44 = vlaneseq  ;;  %p1195_p13 = por %p1194_p12, %p1193_p11 }
  0x4a   :  { %487 = vmatprep.subr.bf16.mxu0 %v993_v10  ;;  %v1034_v58 = vld [vmem:[#allocation6 + $0x124] ss:$8 sps:$4 sm:$0xff]   ;;  %v1094_v59 = vld [vmem:[#allocation8 + $0x60] ss:$8 sps:$4 sm:$0xff]   ;;  %v1095_v60 = vld [vmem:[#allocation8 + $0x74] ss:$8 sps:$4 sm:$0xff]  }
  0x4b   :  { %778 = vmatpush1.bf16.msra.mxu1 %v1082_v37  ;;  %v1032_v61 = vld [vmem:[#allocation6 + $0x120] ss:$8 sps:$4 sm:$0xff]   ;;  %v1037_v62 = vld [vmem:[#allocation6 + $0x134] ss:$8 sps:$4 sm:$0xff]   ;;  %v1097_v63 = vld [vmem:[#allocation8 + $0x70] ss:$8 sps:$4 sm:$0xff]   ;;  %p1196_p0 = pnand %p1195_p13, %p1189_p10 }
  0x4c   :  { %779 = vmatprep.subr.bf16.mxu1 %v1083_v38  ;;  %v1098_v0 = vld [vmem:[#allocation8 + $0x84] ss:$8 sps:$4 sm:$0xff]   ;;  %v1035_v1 = vld [vmem:[#allocation6 + $0x130] ss:$8 sps:$4 sm:$0xff]   ;;  %v1100_v3 = vld [vmem:[#allocation8 + $0x80] ss:$8 sps:$4 sm:$0xff]  }
  0x4d   :  { %488 = vmatpush1.bf16.msra.mxu0 %v995_v11  ;;  %v1040_v2 = vld [vmem:[#allocation6 + $0x144] ss:$8 sps:$4 sm:$0xff]   ;;  %v1101_v4 = vld [vmem:[#allocation8 + $0x94] ss:$8 sps:$4 sm:$0xff]   ;;  %v1038_v5 = vld [vmem:[#allocation6 + $0x140] ss:$8 sps:$4 sm:$0xff]  }
  0x4e   :  { %489 = vmatprep.subr.bf16.mxu0 %v996_v12  ;;  %v1043_v6 = vld [vmem:[#allocation6 + $0x154] ss:$8 sps:$4 sm:$0xff]   ;;  %v1103_v7 = vld [vmem:[#allocation8 + $0x90] ss:$8 sps:$4 sm:$0xff]   ;;  %v1104_v8 = vld [vmem:[#allocation8 + $0xa4] ss:$8 sps:$4 sm:$0xff]  }
  0x4f   :  { %780 = vmatpush1.bf16.msra.mxu1 %v1085_v42  ;;  %v1041_v9 = vld [vmem:[#allocation6 + $0x150] ss:$8 sps:$4 sm:$0xff]   ;;  %v1046_v10 = vld [vmem:[#allocation6 + $0x164] ss:$8 sps:$4 sm:$0xff]   ;;  %v1106_v11 = vld [vmem:[#allocation8 + $0xa0] ss:$8 sps:$4 sm:$0xff]  }
  0x50   :  { %781 = vmatprep.subr.bf16.mxu1 %v1086_v45  ;;  %v1107_v12 = vld [vmem:[#allocation8 + $0xb4] ss:$8 sps:$4 sm:$0xff]   ;;  %v1044_v13 = vld [vmem:[#allocation6 + $0x160] ss:$8 sps:$4 sm:$0xff]   ;;  %v1109_v15 = vld [vmem:[#allocation8 + $0xb0] ss:$8 sps:$4 sm:$0xff]  }
  0x51   :  { %490 = vmatpush1.bf16.msra.mxu0 %v998_v16  ;;  %v1049_v14 = vld [vmem:[#allocation6 + $0x174] ss:$8 sps:$4 sm:$0xff]   ;;  %v1110_v16 = vld [vmem:[#allocation8 + $0xc4] ss:$8 sps:$4 sm:$0xff]   ;;  %v1062_v29 = vld [vmem:[#allocation6 + $0x1c0] ss:$8 sps:$4 sm:$0xff]  }
  0x52   :  { %491 = vmatprep.subr.bf16.mxu0 %v999_v17  ;;  %v1047_v17 = vld [vmem:[#allocation6 + $0x170] ss:$8 sps:$4 sm:$0xff]   ;;  %v1064_v28 = vld [vmem:[#allocation6 + $0x1c4] ss:$8 sps:$4 sm:$0xff]   ;;  %v1068_v33 = vld [vmem:[#allocation6 + $0x1e0] ss:$8 sps:$4 sm:$0xff]  }
  0x53   :  { %782 = vmatpush1.bf16.msra.mxu1 %v1088_v49  ;;  %v1065_v31 = vld [vmem:[#allocation6 + $0x1d0] ss:$8 sps:$4 sm:$0xff]   ;;  %v1073_v34 = vld [vmem:[#allocation6 + $0x1f4] ss:$8 sps:$4 sm:$0xff]   ;;  %v148_v45 = vshrl.u32 %v147_v44, 7 }
  0x54   :  { %783 = vmatprep.subr.bf16.mxu1 %v1089_v51  ;;  %v75_v37 = vld [vmem:[#allocation3 + $0x30] sm:$0xff]  ;;  %v145_v47 = vld [vmem:[%s1335_s2] sm:$0x3] }
  0x55   :  { %492 = vmatpush1.bf16.msra.mxu0 %v1001_v18  ;;  %v1052_v18 = vld [vmem:[#allocation6 + $0x184] ss:$8 sps:$4 sm:$0xff]   ;;  %v1119_v42 = vld [vmem:[#allocation8 + $0xf4] ss:$8 sps:$4 sm:$0xff]   ;;  %v149_v46 = vsub.s32 0, %v148_v45  ;;  %v153_v48 = vsub.s32 1, %v148_v45 }
  0x56   :  { %493 = vmatprep.subr.bf16.mxu0 %v1002_v19  ;;  %v1112_v19 = vld [vmem:[#allocation8 + $0xc0] ss:$8 sps:$4 sm:$0xff]  }
  0x57   :  { %784 = vmatpush1.bf16.msra.mxu1 %v1091_v55  ;;  %v150_v49 = vrot.slane %v145_v47, %v149_v46 }
  0x58   :  { %785 = vmatprep.subr.bf16.mxu1 %v1092_v56 }
  0x59   :  { %494 = vmatpush1.bf16.msra.mxu0 %v1004_v20  ;;  %v1113_v20 = vld [vmem:[#allocation8 + $0xd4] ss:$8 sps:$4 sm:$0xff]  }
  0x5a   :  { %495 = vmatprep.subr.bf16.mxu0 %v1005_v21  ;;  %v1050_v21 = vld [vmem:[#allocation6 + $0x180] ss:$8 sps:$4 sm:$0xff]  }
  0x5b   :  { %786 = vmatpush1.bf16.msra.mxu1 %v1094_v59 }
  0x5c   :  { %787 = vmatprep.subr.bf16.mxu1 %v1095_v60 }
  0x5d   :  { %496 = vmatpush1.bf16.msra.mxu0 %v1007_v22  ;;  %v1055_v22 = vld [vmem:[#allocation6 + $0x194] ss:$8 sps:$4 sm:$0xff]  }
  0x5e   :  { %497 = vmatprep.subr.bf16.mxu0 %v1008_v23  ;;  %v1053_v23 = vld [vmem:[#allocation6 + $0x190] ss:$8 sps:$4 sm:$0xff]  }
  0x5f   :  { %788 = vmatpush1.bf16.msra.mxu1 %v1097_v63 }
  0x60   :  { %789 = vmatprep.subr.bf16.mxu1 %v1098_v0 }
  0x61   :  { %498 = vmatpush1.bf16.msra.mxu0 %v1010_v24  ;;  %v1058_v24 = vld [vmem:[#allocation6 + $0x1a4] ss:$8 sps:$4 sm:$0xff]  }
  0x62   :  { %499 = vmatprep.subr.bf16.mxu0 %v1011_v25  ;;  %v1056_v25 = vld [vmem:[#allocation6 + $0x1a0] ss:$8 sps:$4 sm:$0xff]  }
  0x63   :  { %790 = vmatpush1.bf16.msra.mxu1 %v1100_v3 }
  0x64   :  { %791 = vmatprep.subr.bf16.mxu1 %v1101_v4  ;;  %v820_v4 = vld [vmem:[%s1338_s5] sm:$0x3] }
  0x65   :  { %500 = vmatpush1.bf16.msra.mxu0 %v1013_v26  ;;  %v1061_v26 = vld [vmem:[#allocation6 + $0x1b4] ss:$8 sps:$4 sm:$0xff]  }
  0x66   :  { %501 = vmatprep.subr.bf16.mxu0 %v1014_v27  ;;  %v1059_v27 = vld [vmem:[#allocation6 + $0x1b0] ss:$8 sps:$4 sm:$0xff]  }
  0x67   :  { %792 = vmatpush1.bf16.msra.mxu1 %v1103_v7 }
  0x68   :  { %793 = vmatprep.subr.bf16.mxu1 %v1104_v8  ;;  %v825_v8 = vrot.slane %v820_v4, %v149_v46 }
  0x69   :  { %502 = vmatpush1.bf16.msra.mxu0 %v1016_v30  ;;  %v1067_v30 = vld [vmem:[#allocation6 + $0x1d4] ss:$8 sps:$4 sm:$0xff]  }
  0x6a   :  { %503 = vmatprep.subr.bf16.mxu0 %v1017_v32  ;;  %v1070_v32 = vld [vmem:[#allocation6 + $0x1e4] ss:$8 sps:$4 sm:$0xff]  }
  0x6b   :  { %794 = vmatpush1.bf16.msra.mxu1 %v1106_v11  ;;  %v829_v11 = vrot.slane %v820_v4, %v153_v48 }
  0x6c   :  { %795 = vmatprep.subr.bf16.mxu1 %v1107_v12 }
  0x6d   :  { %504 = vmatpush1.bf16.msra.mxu0 %v1019_v35  ;;  %v1071_v35 = vld [vmem:[#allocation6 + $0x1f0] ss:$8 sps:$4 sm:$0xff]  }
  0x6e   :  { %505 = vmatprep.subr.bf16.mxu0 %v1020_v36  ;;  %v71_v36 = vld [vmem:[#allocation3 + $0x10] sm:$0xff] }
  0x6f   :  { %796 = vmatpush1.bf16.msra.mxu1 %v1109_v15  ;;  %v79_v38 = vpack.c.bf16 %v75_v37, %v71_v36 }
  0x70   :  { %797 = vmatprep.subr.bf16.mxu1 %v1110_v16 }
  0x71   :  { %506 = vmatpush1.bf16.msra.mxu0 %v1022_v39  ;;  %v1115_v39 = vld [vmem:[#allocation8 + $0xd0] ss:$8 sps:$4 sm:$0xff]  }
  0x72   :  { %507 = vmatprep.subr.bf16.mxu0 %v1023_v40  ;;  %v1116_v40 = vld [vmem:[#allocation8 + $0xe4] ss:$8 sps:$4 sm:$0xff]  }
  0x73   :  { %798 = vmatpush1.bf16.msra.mxu1 %v1112_v19 }
  0x74   :  { %799 = vmatprep.subr.bf16.mxu1 %v1113_v20 }
  0x75   :  { %508 = vmatpush1.bf16.msra.mxu0 %v1025_v41  ;;  %v1118_v41 = vld [vmem:[#allocation8 + $0xe0] ss:$8 sps:$4 sm:$0xff]  }
  0x76   :  { %520 = vmatprep.subr.bf16.mxu0 %v1028_v43  ;;  %v1121_v43 = vld [vmem:[#allocation8 + $0xf0] ss:$8 sps:$4 sm:$0xff]  }
  0x77   :  { %800 = vmatpush1.bf16.msra.mxu1 %v1115_v39 }
  0x78   :  { %510 = vmatmul.mubr.bf16.vlgmr.msra.gmra.mrb[0].mxu0 %v77_v50  ;;  %801 = vmatprep.subr.bf16.mxu1 %v1116_v40  ;;  %v154_v50 = vrot.slane %v145_v47, %v153_v48 }
  0x79   :  { %521 = vmatpush1.bf16.msra.mxu0 %v1026_v52  ;;  %552 = vmatprep.mubr.bf16.mxu0 %v80_v54 }
  0x7a   :  { %522 = vmatprep.subr.bf16.mxu0 %v1031_v53 }
  0x7b   :  { %802 = vmatpush1.bf16.msra.mxu1 %v1118_v41 }
  0x7c   :  { %803 = vmatprep.subr.bf16.mxu1 %v1119_v42 }
  0x7d   :  { %523 = vmatpush1.bf16.msra.mxu0 %v1029_v57 }
  0x7e   :  { %524 = vmatprep.subr.bf16.mxu0 %v1034_v58 }
  0x7f   :  { %804 = vmatpush1.bf16.msra.mxu1 %v1121_v43 }
  0x81   :  { %525 = vmatpush1.bf16.msra.mxu0 %v1032_v61 }
  0x82   :  { %526 = vmatprep.subr.bf16.mxu0 %v1037_v62 }
  0x85   :  { %527 = vmatpush1.bf16.msra.mxu0 %v1035_v1  ;;  %v601_v1 = vld [vmem:[%s1337_s4] sm:$0x3] }
  0x86   :  { %528 = vmatprep.subr.bf16.mxu0 %v1040_v2  ;;  %v606_v2 = vrot.slane %v601_v1, %v149_v46  ;;  %v610_v3 = vrot.slane %v601_v1, %v153_v48 }
  0x89   :  { %529 = vmatpush1.bf16.msra.mxu0 %v1038_v5 }
  0x8a   :  { %530 = vmatprep.subr.bf16.mxu0 %v1043_v6 }
  0x8d   :  { %531 = vmatpush1.bf16.msra.mxu0 %v1041_v9 }
  0x8e   :  { %532 = vmatprep.subr.bf16.mxu0 %v1046_v10 }
  0x91   :  { %533 = vmatpush1.bf16.msra.mxu0 %v1044_v13 }
  0x92   :  { %534 = vmatprep.subr.bf16.mxu0 %v1049_v14 }
  0x95   :  { %535 = vmatpush1.bf16.msra.mxu0 %v1047_v17 }
  0x96   :  { %536 = vmatprep.subr.bf16.mxu0 %v1052_v18 }
  0x99   :  { %537 = vmatpush1.bf16.msra.mxu0 %v1050_v21 }
  0x9a   :  { %538 = vmatprep.subr.bf16.mxu0 %v1055_v22 }
  0x9d   :  { %539 = vmatpush1.bf16.msra.mxu0 %v1053_v23 }
  0x9e   :  { %540 = vmatprep.subr.bf16.mxu0 %v1058_v24 }
  0xa1   :  { %541 = vmatpush1.bf16.msra.mxu0 %v1056_v25  ;;  %v843_v25 = vstv %s1339_s6 }
  0xa2   :  { %542 = vmatprep.subr.bf16.mxu0 %v1061_v26 }
  0xa5   :  { %543 = vmatpush1.bf16.msra.mxu0 %v1059_v27 }
  0xa6   :  { %544 = vmatprep.subr.bf16.mxu0 %v1064_v28 }
  0xa9   :  { %545 = vmatpush1.bf16.msra.mxu0 %v1062_v29 }
  0xaa   :  { %546 = vmatprep.subr.bf16.mxu0 %v1067_v30 }
  0xad   :  { %547 = vmatpush1.bf16.msra.mxu0 %v1065_v31 }
  0xae   :  { %548 = vmatprep.subr.bf16.mxu0 %v1070_v32 }
  0xb1   :  { %549 = vmatpush1.bf16.msra.mxu0 %v1068_v33 }
  0xb2   :  { %550 = vmatprep.subr.bf16.mxu0 %v1073_v34 }
  0xb5   :  { %551 = vmatpush1.bf16.msra.mxu0 %v1071_v35 }
  0xb8   :  { %553 = vmatmul.mubr.bf16.vlgmr.msra.gmra.mrb[0].mxu0 %v79_v38 }
 0x18b   :  { %v554_v51 = vpop.f32.mrb[0].mxu0 }
 0x18c   :  { %v962_v52 = vadd.f32 %v554_v51, %v150_v49  ;;  %v556_v53 = vpop.f32.mrb[1].mxu0 }
 0x18d   :  { %v963_v54 = vadd.f32 %v556_v53, %v154_v50  ;;  %v558_v55 = vpop.f32.mrb[2].mxu0 }
 0x18e   :  { %v964_v56 = vadd.f32 %v558_v55, %v150_v49  ;;  %v560_v57 = vpop.f32.mrb[3].mxu0  ;;  %v563_v59 = vmax.f32 %v962_v52, 0.0 }
 0x18f   :  { %v965_v58 = vadd.f32 %v560_v57, %v154_v50  ;;  %v564_v61 = vmax.f32 %v963_v54, 0.0 }
 0x190   :  { %v565_v60 = vmax.f32 %v964_v56, 0.0 }
 0x191   :  { %v566_v62 = vmax.f32 %v965_v58, 0.0 }
 0x192   :  { %v567_v63 = vpack.c.bf16 %v565_v60, %v563_v59 }
 0x193   :  { %v568_v0 = vpack.c.bf16 %v566_v62, %v564_v61 }
 0x195   :  { %805 = vmatprep.mubr.bf16.mxu1 %v568_v0 }
 0x196   :  { %806 = vmatmul.mubr.bf16.vlgmr.msra.gmra.mrb[0].mxu1 %v567_v63 }
 0x269   :  { %v807_v5 = vpop.f32.mrb[0].mxu1 }
 0x26a   :  { %v808_v6 = vadd.f32 %v807_v5, %v606_v2  ;;  %v809_v7 = vpop.f32.mrb[1].mxu1 }
 0x26b   :  { %v810_v9 = vadd.f32 %v809_v7, %v610_v3  ;;  %v811_v10 = vpop.f32.mrb[2].mxu1 }
 0x26c   :  { %v816_v12 = vmax.f32 %v808_v6, 0.0  ;;  %v812_v13 = vadd.f32 %v811_v10, %v606_v2  ;;  %v813_v14 = vpop.f32.mrb[3].mxu1 }
 0x26d   :  { %v817_v15 = vmax.f32 %v810_v9, 0.0  ;;  %v814_v16 = vadd.f32 %v813_v14, %v610_v3 }
 0x26e   :  { %v818_v17 = vmax.f32 %v812_v13, 0.0  ;;  %v832_v18 = vmul.f32 %v825_v8, %v816_v12 }
 0x26f   :  { %v819_v19 = vmax.f32 %v814_v16, 0.0  ;;  %v833_v20 = vmul.f32 %v829_v11, %v817_v15 }
 0x270   :  { %v834_v21 = vmul.f32 %v825_v8, %v818_v17 }
 0x271   :  { %v835_v22 = vmul.f32 %v829_v11, %v819_v19  ;;  %v836_v23 = vadd.f32 %v833_v20, %v832_v18 }
 0x273   :  { %837 = vadd.xlane.f32.xlu0 %v836_v23  ;;  %v839_v24 = vadd.f32 %v835_v22, %v834_v21 }
 0x277   :  { %840 = vadd.xlane.f32.xlu0 %v839_v24 }
 0x300   :  { %v838_v26 = vpop.xlane.xlu0 %837 }
 0x301   :  { %v844_v27 = vadd.f32 %v843_v25, %v838_v26 }
 0x303   :  { %846 = vst [vmem:[#allocation9] sm:$0xff] %v844_v27 }
 0x304   :  { %v841_v28 = vpop.xlane.xlu0 %840 }
 0x305   :  { %v845_v29 = vadd.f32 %v843_v25, %v841_v28 }
 0x307   :  { %847 = vst [vmem:[#allocation9 + $0x8] sm:$0xff] %v845_v29 }
 0x308   :  { %1199 = shalt.err (!%p1196_p0)
}
 0x309   :  { %s1200_s6 = scalar_lea.hbm %s1340_s7, 256 }
 0x30a   :  { %p1201_p1 = scmp.ne.s32.totalorder %s1340_s7, %s1200_s6  ;;  %p1204_p2 = scmp.lt.u32.totalorder %s1200_s6, %s1340_s7 }
 0x30c   :  { %p1206_p3 = pnand %p1204_p2, %p1201_p1 }
 0x30e   :  { %1209 = shalt.err (!%p1206_p3)
}
 0x30f   :  { %859 = dma.vmem_to_hbm [thread:$0]  %s854_s23, 256, %s1340_s7, [#allocation5], %s1217_s11, %s1217_s11, %s1218_s12  }
 0x310   :  { %1214 = dma.done.wait [#allocation5], 256  }
 0x311   :  { %1215 = vsyncadd [#allocation5], 4294967040 }
 0x312   :  { %863 = vsyncpa [#allocation4], 1 }
 0x313   :  { %864 = vsyncpa [#allocation7], 1 }
 0x314   :  { %865 = vsyncpa [#allocation5], 1 }

</bundles_post_ra>
